<compile_context>
chip_gen: v6e
topology: v6e:2x2x1
jax: 0.10.0
libtpu: 0.0.40
codegen_flags: <defaults>
</compile_context>

<pallas_src>
import jax
import jax.numpy as jnp
from jax.experimental import pallas as pl
from jax.experimental.pallas import tpu as pltpu


def _round_up(x, m):
    return (x + m - 1) // m * m


def _pick_tb(batch):
    """Batch tile: big enough for the MXU, small enough to keep >=2 grid steps
    (so the 'parallel' batch axis can shard across v7x's two TensorCores)."""
    b16 = _round_up(batch, 16)            # >=16 sublanes (bf16 packing in-kernel)
    if b16 >= 512:
        return 256                        # v6e/v7x MXU is 2x256^2
    if b16 >= 256:
        return 128
    if b16 >= 32:
        return _round_up(b16 // 2, 16)    # guarantee >=2 batch grid steps
    return b16


def _pick_tk(feat):
    """K tile for streaming Wfm_s when it is too large to keep resident."""
    if feat <= 2048:
        return feat                       # resident: bf16 Wfm_s <= 8 MiB
    for tk in (1024, 512, 256, 128):
        if feat % tk == 0:
            return tk
    # TODO(synk): pad feat to a multiple of 128 to enable K-streaming for very
    #             large, non-lane-aligned feature sizes.
    return feat


def _vmem_limit_bytes():
    """~85% of physical VMEM: ~54 MiB on v7x (64 MiB), ~109 MiB on v5e/v6e."""
    try:
        return int(pltpu.get_tpu_info().vmem_capacity_bytes * 0.85)
    except Exception:
        return 64 * 1024 * 1024


def _const_spec(shape):
    """Constant-index (weight/bias) BlockSpec, single-buffered: its index_map
    never changes, so double-buffering would only double resident VMEM."""
    idx = lambda i, k: (0,) * len(shape)
    try:
        return pl.BlockSpec(shape, idx, pipeline_mode=pl.Buffered(1))
    except (AttributeError, TypeError):   # older JAX: fall back to default
        return pl.BlockSpec(shape, idx)


def _metacritic_kernel(x_ref, a_ref, wfs_ref, wfa_ref, bfm_ref,
                       w1_ref, b1_ref, w2_ref, b2_ref,
                       pred_ref, err_ref):
    k = pl.program_id(1)

    # --- synthetic forward model: pred = x @ Wfm_s + action @ Wfm_a + bfm ---
    # pred_ref's index_map is k-invariant, so the output block stays resident
    # in VMEM across the K axis and doubles as the f32 accumulator.
    @pl.when(k == 0)
    def _():
        pred_ref[...] = (
            jnp.dot(a_ref[...].astype(jnp.bfloat16), wfa_ref[...],
                    preferred_element_type=jnp.float32)
            + bfm_ref[...])

    pred_ref[...] += jnp.dot(x_ref[...].astype(jnp.bfloat16), wfs_ref[...],
                             preferred_element_type=jnp.float32)

    # --- metacritic head: Flatten -> LeakyReLU -> Linear -> LeakyReLU -> Linear ---
    @pl.when(k == pl.num_programs(1) - 1)
    def _():
        pred = pred_ref[...]
        h = jnp.where(pred > 0, pred, 0.01 * pred)                    # LeakyReLU, f32
        h1 = jnp.dot(h.astype(jnp.bfloat16), w1_ref[...],
                     preferred_element_type=jnp.float32) + b1_ref[...]
        h1 = jnp.where(h1 > 0, h1, 0.01 * h1)                         # LeakyReLU, f32
        # Linear(hidden, 1) as VPU mul + lane reduction (no 1-column MXU matmul).
        err_ref[...] = (jnp.sum(h1 * w2_ref[...], axis=-1, keepdims=True)
                        + b2_ref[0])


def metacritic_forward(state, action, params):
    """state: (B, C, W) float32, action: (B, A) float32."""
    B, C, W = state.shape
    feat = C * W
    A = action.shape[-1]
    hidden_pad = params["w1"].shape[1]

    TB = _pick_tb(B)
    B_pad = _round_up(B, TB)
    TK = _pick_tk(feat)
    nk = max(feat // TK, 1)
    grid = (B_pad // TB, nk)

    # No wrapper-side dtype cast: f32 activations go straight in; the bf16
    # cast is fused into the kernel. Only ragged batches pay a pad pass.
    x = state.reshape(B, feat)
    a = action
    if B_pad != B:
        x = jnp.pad(x, ((0, B_pad - B), (0, 0)))
        a = jnp.pad(a, ((0, B_pad - B), (0, 0)))

    if nk == 1:
        x_spec = pl.BlockSpec((TB, feat), lambda i, k: (i, 0))
        wfs_spec = _const_spec((feat, feat))                    # resident, single-buffered
    else:
        x_spec = pl.BlockSpec((TB, TK), lambda i, k: (i, k))
        wfs_spec = pl.BlockSpec((TK, feat), lambda i, k: (k, 0))  # streamed, double-buffered

    # Advisory cost estimate (matmul flops + bytes moved).
    flops = (2 * B_pad * feat * (feat + hidden_pad)
             + 2 * B_pad * A * feat + 2 * B_pad * hidden_pad)
    weight_bytes = sum(int(v.size) * v.dtype.itemsize for v in params.values())
    bytes_accessed = ((B_pad * feat + B_pad * A) * 4 + weight_bytes
                      + B_pad * feat * 4 + B_pad * 4)

    pred_pad, err_pad = pl.pallas_call(
        _metacritic_kernel,
        out_shape=(
            jax.ShapeDtypeStruct((B_pad, feat), jnp.float32),
            jax.ShapeDtypeStruct((B_pad, 1), jnp.float32),
        ),
        grid_spec=pltpu.PrefetchScalarGridSpec(
            num_scalar_prefetch=0,
            grid=grid,
            in_specs=[
                x_spec,                                          # x (per batch/K tile)
                pl.BlockSpec((TB, A), lambda i, k: (i, 0)),      # action (per batch tile)
                wfs_spec,                                        # Wfm_s
                _const_spec((A, feat)),                          # Wfm_a (resident)
                _const_spec((1, feat)),                          # bfm
                _const_spec((feat, hidden_pad)),                 # w1 (resident)
                _const_spec((1, hidden_pad)),                    # b1
                _const_spec((1, hidden_pad)),                    # w2 (row vector)
                pl.BlockSpec(memory_space=pltpu.MemorySpace.SMEM),  # b2 (scalar path)
            ],
            out_specs=(
                pl.BlockSpec((TB, feat), lambda i, k: (i, 0)),   # pred (flat, K-resident acc)
                pl.BlockSpec((TB, 1), lambda i, k: (i, 0)),      # err
            ),
        ),
        compiler_params=pltpu.CompilerParams(
            dimension_semantics=("parallel", "arbitrary"),
            vmem_limit_bytes=_vmem_limit_bytes(),
        ),
        cost_estimate=pl.CostEstimate(
            flops=flops, transcendentals=0, bytes_accessed=bytes_accessed),
    )(x, a, params["wfm_s"], params["wfm_a"], params["bfm"],
      params["w1"], params["b1"], params["w2"], params["b2"])

    predicted_state = pred_pad[:B].reshape(B, C, W)
    error_estimate = err_pad[:B]
    return predicted_state, error_estimate


def init_params(key, input_shape, action_dim):
    C, W = input_shape
    feat = C * W
    hidden = feat // 2
    hidden_pad = _round_up(hidden, 128)
    k_fs, k_fa, k_w1, k_w2 = jax.random.split(key, 4)

    # synthetic forward-model weights (deterministic stand-in), bf16 for the MXU
    wfm_s = (jax.random.normal(k_fs, (feat, feat), jnp.float32) * 0.05).astype(jnp.bfloat16)
    wfm_a = (jax.random.normal(k_fa, (action_dim, feat), jnp.float32) * 0.05).astype(jnp.bfloat16)
    bfm = jnp.zeros((1, feat), jnp.float32)

    # layers[2]: Linear(feat, feat//2), xavier_uniform_; zero-padded to lane width.
    bound1 = (6.0 / (feat + hidden)) ** 0.5
    w1 = jax.random.uniform(k_w1, (feat, hidden), jnp.float32, -bound1, bound1)
    w1 = jnp.pad(w1, ((0, 0), (0, hidden_pad - hidden))).astype(jnp.bfloat16)
    b1 = jnp.zeros((1, hidden_pad), jnp.float32)

    # layers[4]: Linear(feat//2, 1), uniform_(-0.003, 0.003); stored as a row
    # vector so the final layer is a VPU reduction, zero-padded (exact).
    w2 = jax.random.uniform(k_w2, (1, hidden), jnp.float32, -0.003, 0.003)
    w2 = jnp.pad(w2, ((0, 0), (0, hidden_pad - hidden)))
    b2 = jnp.zeros((1,), jnp.float32)

    return {"wfm_s": wfm_s, "wfm_a": wfm_a, "bfm": bfm,
            "w1": w1, "b1": b1, "w2": w2, "b2": b2}


def _reference(state, action, params):
    """Pure-JAX reference with the same bf16 matmul inputs / f32 accumulation.
    NOTE: bf16 MXU inputs are a deliberate numerics change vs PyTorch f32."""
    B, C, W = state.shape
    feat = C * W
    x = state.reshape(B, feat).astype(jnp.bfloat16)
    a = action.astype(jnp.bfloat16)
    pred = (jnp.dot(x, params["wfm_s"], preferred_element_type=jnp.float32)
            + jnp.dot(a, params["wfm_a"], preferred_element_type=jnp.float32)
            + params["bfm"])
    h = jnp.where(pred > 0, pred, 0.01 * pred)
    h1 = jnp.dot(h.astype(jnp.bfloat16), params["w1"],
                 preferred_element_type=jnp.float32) + params["b1"]
    h1 = jnp.where(h1 > 0, h1, 0.01 * h1)
    err = jnp.sum(h1 * params["w2"], axis=-1, keepdims=True) + params["b2"][0]
    return pred.reshape(B, C, W), err


if __name__ == "__main__":
    key = jax.random.PRNGKey(0)
    k_state, k_action, k_params = jax.random.split(key, 3)

    B = 2
    input_shape = (4, 32)   # (channels, width) -> feat = 128 (lane-aligned)
    action_dim = 4

    state = jax.random.normal(k_state, (B, *input_shape), jnp.float32)
    action = jax.random.normal(k_action, (B, action_dim), jnp.float32)
    params = init_params(k_params, input_shape, action_dim)

    predicted_state, error_estimate = jax.jit(metacritic_forward)(state, action, params)
    jax.block_until_ready((predicted_state, error_estimate))

    assert predicted_state.shape == (B, *input_shape)
    assert error_estimate.shape == (B, 1)

    ref_pred, ref_err = _reference(state, action, params)
    assert jnp.allclose(predicted_state, ref_pred, rtol=2e-2, atol=2e-2)
    assert jnp.allclose(error_estimate, ref_err, rtol=2e-2, atol=2e-2)
    print("KERNEL_OK")
</pallas_src>

<mosaic_0001>
module attributes {stable_mosaic.version = 11 : i64} {
  func.func @_metacritic_kernel(%arg0: i32, %arg1: i32, %arg2: memref<16x128xf32, #tpu.memory_space<vmem>>, %arg3: memref<16x4xf32, #tpu.memory_space<vmem>>, %arg4: memref<128x128xbf16, #tpu.memory_space<vmem>>, %arg5: memref<4x128xbf16, #tpu.memory_space<vmem>>, %arg6: memref<1x128xf32, #tpu.memory_space<vmem>>, %arg7: memref<128x128xbf16, #tpu.memory_space<vmem>>, %arg8: memref<1x128xf32, #tpu.memory_space<vmem>>, %arg9: memref<1x128xf32, #tpu.memory_space<vmem>>, %arg10: memref<1xf32, #tpu.memory_space<smem>>, %arg11: memref<16x128xf32, #tpu.memory_space<vmem>>, %arg12: memref<16x1xf32, #tpu.memory_space<vmem>>) attributes {dimension_semantics = [#tpu.dimension_semantics<parallel>, #tpu.dimension_semantics<arbitrary>], iteration_bounds = array<i64: 1, 1>, scalar_prefetch = 0 : i64, scratch_operands = 0 : i64, tpu.core_type = #tpu.core_type<tc>, window_params = [{transform_indices = @transform_0, window_bounds = array<i64: 16, 128>}, {transform_indices = @transform_1, window_bounds = array<i64: 16, 4>}, {pipeline_mode = #tpu.pipeline_mode<synchronous>, transform_indices = @transform_2, window_bounds = array<i64: 128, 128>}, {pipeline_mode = #tpu.pipeline_mode<synchronous>, transform_indices = @transform_3, window_bounds = array<i64: 4, 128>}, {pipeline_mode = #tpu.pipeline_mode<synchronous>, transform_indices = @transform_4, window_bounds = array<i64: 1, 128>}, {pipeline_mode = #tpu.pipeline_mode<synchronous>, transform_indices = @transform_5, window_bounds = array<i64: 128, 128>}, {pipeline_mode = #tpu.pipeline_mode<synchronous>, transform_indices = @transform_6, window_bounds = array<i64: 1, 128>}, {pipeline_mode = #tpu.pipeline_mode<synchronous>, transform_indices = @transform_7, window_bounds = array<i64: 1, 128>}, {transform_indices = @transform_8, window_bounds = array<i64: 1>}, {transform_indices = @transform_9, window_bounds = array<i64: 16, 128>}, {transform_indices = @transform_10, window_bounds = array<i64: 16, 1>}]} {
    %c0_i32 = arith.constant 0 : i32
    %0 = arith.cmpi eq, %arg1, %c0_i32 : i32
    %1 = arith.extui %0 : i1 to i32
    %c0_i32_0 = arith.constant 0 : i32
    %2 = arith.cmpi ne, %1, %c0_i32_0 : i32
    scf.if %2 {
      %c0_10 = arith.constant 0 : index
      %c0_11 = arith.constant 0 : index
      %13 = vector.load %arg3[%c0_10, %c0_11] : memref<16x4xf32, #tpu.memory_space<vmem>>, vector<16x4xf32>
      %14 = arith.truncf %13 : vector<16x4xf32> to vector<16x4xbf16>
      %c0_12 = arith.constant 0 : index
      %c0_13 = arith.constant 0 : index
      %15 = vector.load %arg5[%c0_12, %c0_13] : memref<4x128xbf16, #tpu.memory_space<vmem>>, vector<4x128xbf16>
      %cst_14 = arith.constant dense<0.000000e+00> : vector<16x128xf32>
      %16 = tpu.matmul %14, %15, %cst_14 {dimension_numbers = #tpu.dot_dimension_numbers<[1], [0], [0], [1], [0, 0, 1, 1], [], []>} : vector<16x4xbf16>, vector<4x128xbf16>, vector<16x128xf32> -> vector<16x128xf32>
      %c0_15 = arith.constant 0 : index
      %c0_16 = arith.constant 0 : index
      %17 = vector.load %arg6[%c0_15, %c0_16] : memref<1x128xf32, #tpu.memory_space<vmem>>, vector<1x128xf32>
      %18 = vector.broadcast %17 : vector<1x128xf32> to vector<16x128xf32>
      %19 = arith.addf %16, %18 : vector<16x128xf32>
      %c0_17 = arith.constant 0 : index
      %c0_18 = arith.constant 0 : index
      %20 = vector.load %arg11[%c0_17, %c0_18] : memref<16x128xf32, #tpu.memory_space<vmem>>, vector<16x128xf32>
      tpu.vector_store %arg11[%c0_17, %c0_18], %19 {strides = array<i32>} : memref<16x128xf32, #tpu.memory_space<vmem>>, vector<16x128xf32>,
    } else {
    }
    %c0 = arith.constant 0 : index
    %c0_1 = arith.constant 0 : index
    %3 = vector.load %arg11[%c0, %c0_1] : memref<16x128xf32, #tpu.memory_space<vmem>>, vector<16x128xf32>
    %c0_2 = arith.constant 0 : index
    %c0_3 = arith.constant 0 : index
    %4 = vector.load %arg2[%c0_2, %c0_3] : memref<16x128xf32, #tpu.memory_space<vmem>>, vector<16x128xf32>
    %5 = arith.truncf %4 : vector<16x128xf32> to vector<16x128xbf16>
    %c0_4 = arith.constant 0 : index
    %c0_5 = arith.constant 0 : index
    %6 = vector.load %arg4[%c0_4, %c0_5] : memref<128x128xbf16, #tpu.memory_space<vmem>>, vector<128x128xbf16>
    %cst = arith.constant dense<0.000000e+00> : vector<16x128xf32>
    %7 = tpu.matmul %5, %6, %cst {dimension_numbers = #tpu.dot_dimension_numbers<[1], [0], [0], [1], [0, 0, 1, 1], [], []>} : vector<16x128xbf16>, vector<128x128xbf16>, vector<16x128xf32> -> vector<16x128xf32>
    %8 = arith.addf %3, %7 : vector<16x128xf32>
    %c0_6 = arith.constant 0 : index
    %c0_7 = arith.constant 0 : index
    %9 = vector.load %arg11[%c0_6, %c0_7] : memref<16x128xf32, #tpu.memory_space<vmem>>, vector<16x128xf32>
    tpu.vector_store %arg11[%c0_6, %c0_7], %8 {strides = array<i32>} : memref<16x128xf32, #tpu.memory_space<vmem>>, vector<16x128xf32>,
    %c0_i32_8 = arith.constant 0 : i32
    %10 = arith.cmpi eq, %arg1, %c0_i32_8 : i32
    %11 = arith.extui %10 : i1 to i32
    %c0_i32_9 = arith.constant 0 : i32
    %12 = arith.cmpi ne, %11, %c0_i32_9 : i32
    scf.if %12 {
      %c0_10 = arith.constant 0 : index
      %c0_11 = arith.constant 0 : index
      %13 = vector.load %arg11[%c0_10, %c0_11] : memref<16x128xf32, #tpu.memory_space<vmem>>, vector<16x128xf32>
      %cst_12 = arith.constant 0.000000e+00 : f32
      %14 = vector.broadcast %cst_12 : f32 to vector<16x128xf32>
      %15 = arith.cmpf ogt, %13, %14 : vector<16x128xf32>
      %cst_13 = arith.constant 0.00999999977 : f32
      %16 = vector.broadcast %cst_13 : f32 to vector<16x128xf32>
      %17 = arith.mulf %16, %13 : vector<16x128xf32>
      %18 = arith.select %15, %13, %17 : vector<16x128xi1>, vector<16x128xf32>
      %19 = arith.truncf %18 : vector<16x128xf32> to vector<16x128xbf16>
      %c0_14 = arith.constant 0 : index
      %c0_15 = arith.constant 0 : index
      %20 = vector.load %arg7[%c0_14, %c0_15] : memref<128x128xbf16, #tpu.memory_space<vmem>>, vector<128x128xbf16>
      %cst_16 = arith.constant dense<0.000000e+00> : vector<16x128xf32>
      %21 = tpu.matmul %19, %20, %cst_16 {dimension_numbers = #tpu.dot_dimension_numbers<[1], [0], [0], [1], [0, 0, 1, 1], [], []>} : vector<16x128xbf16>, vector<128x128xbf16>, vector<16x128xf32> -> vector<16x128xf32>
      %c0_17 = arith.constant 0 : index
      %c0_18 = arith.constant 0 : index
      %22 = vector.load %arg8[%c0_17, %c0_18] : memref<1x128xf32, #tpu.memory_space<vmem>>, vector<1x128xf32>
      %23 = vector.broadcast %22 : vector<1x128xf32> to vector<16x128xf32>
      %24 = arith.addf %21, %23 : vector<16x128xf32>
      %cst_19 = arith.constant 0.000000e+00 : f32
      %25 = vector.broadcast %cst_19 : f32 to vector<16x128xf32>
      %26 = arith.cmpf ogt, %24, %25 : vector<16x128xf32>
      %cst_20 = arith.constant 0.00999999977 : f32
      %27 = vector.broadcast %cst_20 : f32 to vector<16x128xf32>
      %28 = arith.mulf %27, %24 : vector<16x128xf32>
      %29 = arith.select %26, %24, %28 : vector<16x128xi1>, vector<16x128xf32>
      %c0_21 = arith.constant 0 : index
      %c0_22 = arith.constant 0 : index
      %30 = vector.load %arg9[%c0_21, %c0_22] : memref<1x128xf32, #tpu.memory_space<vmem>>, vector<1x128xf32>
      %31 = vector.broadcast %30 : vector<1x128xf32> to vector<16x128xf32>
      %32 = arith.mulf %29, %31 : vector<16x128xf32>
      %cst_23 = arith.constant dense<0.000000e+00> : vector<16xf32>
      %33 = vector.multi_reduction <add>, %32, %cst_23 [1] : vector<16x128xf32> to vector<16xf32>
      %34 = vector.shape_cast %33 : vector<16xf32> to vector<16x1xf32>
      %c0_24 = arith.constant 0 : index
      %35 = memref.load %arg10[%c0_24] : memref<1xf32, #tpu.memory_space<smem>>
      %36 = vector.broadcast %35 : f32 to vector<16x1xf32>
      %37 = arith.addf %34, %36 : vector<16x1xf32>
      %c0_25 = arith.constant 0 : index
      %c0_26 = arith.constant 0 : index
      %38 = vector.load %arg12[%c0_25, %c0_26] : memref<16x1xf32, #tpu.memory_space<vmem>>, vector<16x1xf32>
      tpu.vector_store %arg12[%c0_25, %c0_26], %37 {strides = array<i32>} : memref<16x1xf32, #tpu.memory_space<vmem>>, vector<16x1xf32>,
    } else {
    }
    return
  }
  func.func @transform_0(%arg0: i32, %arg1: i32) -> (i32, i32) {
    %c0_i32 = arith.constant 0 : i32
    %c0_i32_0 = arith.constant 0 : i32
    return %arg0, %c0_i32 : i32, i32
  }
  func.func @transform_1(%arg0: i32, %arg1: i32) -> (i32, i32) {
    %c0_i32 = arith.constant 0 : i32
    %c0_i32_0 = arith.constant 0 : i32
    return %arg0, %c0_i32 : i32, i32
  }
  func.func @transform_2(%arg0: i32, %arg1: i32) -> (i32, i32) {
    %c0_i32 = arith.constant 0 : i32
    %c0_i32_0 = arith.constant 0 : i32
    %c0_i32_1 = arith.constant 0 : i32
    return %c0_i32, %c0_i32_0 : i32, i32
  }
  func.func @transform_3(%arg0: i32, %arg1: i32) -> (i32, i32) {
    %c0_i32 = arith.constant 0 : i32
    %c0_i32_0 = arith.constant 0 : i32
    %c0_i32_1 = arith.constant 0 : i32
    return %c0_i32, %c0_i32_0 : i32, i32
  }
  func.func @transform_4(%arg0: i32, %arg1: i32) -> (i32, i32) {
    %c0_i32 = arith.constant 0 : i32
    %c0_i32_0 = arith.constant 0 : i32
    %c0_i32_1 = arith.constant 0 : i32
    return %c0_i32, %c0_i32_0 : i32, i32
  }
  func.func @transform_5(%arg0: i32, %arg1: i32) -> (i32, i32) {
    %c0_i32 = arith.constant 0 : i32
    %c0_i32_0 = arith.constant 0 : i32
    %c0_i32_1 = arith.constant 0 : i32
    return %c0_i32, %c0_i32_0 : i32, i32
  }
  func.func @transform_6(%arg0: i32, %arg1: i32) -> (i32, i32) {
    %c0_i32 = arith.constant 0 : i32
    %c0_i32_0 = arith.constant 0 : i32
    %c0_i32_1 = arith.constant 0 : i32
    return %c0_i32, %c0_i32_0 : i32, i32
  }
  func.func @transform_7(%arg0: i32, %arg1: i32) -> (i32, i32) {
    %c0_i32 = arith.constant 0 : i32
    %c0_i32_0 = arith.constant 0 : i32
    %c0_i32_1 = arith.constant 0 : i32
    return %c0_i32, %c0_i32_0 : i32, i32
  }
  func.func @transform_8(%arg0: i32, %arg1: i32) -> i32 {
    %c0_i32 = arith.constant 0 : i32
    %c0_i32_0 = arith.constant 0 : i32
    return %c0_i32 : i32
  }
  func.func @transform_9(%arg0: i32, %arg1: i32) -> (i32, i32) {
    %c0_i32 = arith.constant 0 : i32
    %c0_i32_0 = arith.constant 0 : i32
    return %arg0, %c0_i32 : i32, i32
  }
  func.func @transform_10(%arg0: i32, %arg1: i32) -> (i32, i32) {
    %c0_i32 = arith.constant 0 : i32
    %c0_i32_0 = arith.constant 0 : i32
    return %arg0, %c0_i32 : i32, i32
  }
}

</mosaic_0001>

<bundles_post_ra>
// kernel: metacritic_forward.1
= control target key start
LH: loop header
LB: loop body
LE: loop exit
PB: predicated region body
PF: predicated region fallthrough
CT: control target
= control target key end

     0   :  { %17 = vsyncpa [#allocation4], 0  ;;  %s685_s0 = inlined_call_operand.vmem [shape: f32[16,128], index: 0, kind: input, shape index: {}]   ;;  %s686_s1 = inlined_call_operand.vmem [shape: f32[16,4], index: 1, kind: input, shape index: {}]   ;;  %s687_s2 = inlined_call_operand.hbm [shape: bf16[128,128], index: 2, kind: input, shape index: {}]   ;;  %s688_s3 = inlined_call_operand.vmem [shape: bf16[4,128], index: 3, kind: input, shape index: {}]   ;;  %s689_s4 = inlined_call_operand.vmem [shape: f32[1,128], index: 4, kind: input, shape index: {}]   ;;  %s690_s5 = inlined_call_operand.hbm [shape: bf16[128,128], index: 5, kind: input, shape index: {}]   ;;  %s691_s6 = inlined_call_operand.vmem [shape: f32[1,128], index: 6, kind: input, shape index: {}]   ;;  %s692_s7 = inlined_call_operand.vmem [shape: f32[1,128], index: 7, kind: input, shape index: {}]   ;;  %s693_s8 = inlined_call_operand.<no memory space> [shape: f32[1], index: 8, kind: input, shape index: {}]   ;;  %s694_s9 = inlined_call_operand.vmem [shape: f32[16,128], index: 9, kind: output, shape index: {0}]   ;;  %s695_s10 = inlined_call_operand.vmem [shape: f32[16,1], index: 10, kind: output, shape index: {1}]  }
   0x1   :  { %18 = vsyncpa [#allocation6], 0  ;;  %s556_s13 = smov [#allocation3]  }
   0x2   :  { %s28_s14 = sshll.u32 %s556_s13, 4  ;;  %s29_s14 = int_to_ptr.vmem [resolvable:$true] %s28_s14 }
   0x3   :  { %s520_s15 = scalar_lea.vmem %s29_s14, 1024  ;;  %p525_p1 = scmp.lt.s32.totalorder %s29_s14, %s29_s14 }
   0x4   :  { %p521_p0 = scmp.ne.s32.totalorder %s29_s14, %s520_s15  ;;  %p526_p2 = scmp.lt.s32.totalorder %s520_s15, %s520_s15 }
   0x6   :  { %p527_p3 = por %p526_p2, %p525_p1 }
   0x8   :  { %p528_p4 = pnand %p527_p3, %p521_p0 }
   0xa   :  { %531 = shalt.err (!%p528_p4)
}
   0xb   :  { %s557_s16 = smov 64   ;;  %s558_s17 = smov 4  }
   0xc   :  { %34 = dma.hbm_to_vmem [thread:$0]  %s687_s2, 1024, %s29_s14, [#allocation4], %s557_s16, %s557_s16, %s558_s17  }
   0xd   :  { %s559_s20 = smov [#allocation5]  }
   0xe   :  { %s44_s21 = sshll.u32 %s559_s20, 4  ;;  %s45_s21 = int_to_ptr.vmem [resolvable:$true] %s44_s21 }
   0xf   :  { %s540_s22 = scalar_lea.vmem %s45_s21, 1024  ;;  %p545_p6 = scmp.lt.s32.totalorder %s45_s21, %s45_s21 }
  0x10   :  { %p541_p5 = scmp.ne.s32.totalorder %s45_s21, %s540_s22  ;;  %p546_p7 = scmp.lt.s32.totalorder %s540_s22, %s540_s22 }
  0x12   :  { %p547_p8 = por %p546_p7, %p545_p6 }
  0x14   :  { %p548_p9 = pnand %p547_p8, %p541_p5 }
  0x16   :  { %551 = shalt.err (!%p548_p9)
}
  0x17   :  { %50 = dma.hbm_to_vmem [thread:$0]  %s690_s5, 1024, %s45_s21, [#allocation6], %s557_s16, %s557_s16, %s558_s17  }
  0x18   :  { %552 = dma.done.wait [#allocation4], 1024  }
  0x19   :  { %553 = vsyncadd [#allocation4], 4294966272 }
  0x1a   :  { %554 = dma.done.wait [#allocation6], 1024  }
  0x1b   :  { %555 = vsyncadd [#allocation6], 4294966272  ;;  %v560_v0 = vmov 0.0   ;;  %vm561_vm0 = vmmov 0   ;;  %v496_v1 = vld [vmem:[#allocation3 + $0x38] sm:$0xff]   ;;  %vm83_vm1 = vcmask 1041408   ;;  %v388_v57 = vstv %s693_s8 }
  0x1c   :  { %450 = vmatprep.subr.bf16.mxu1 %v560_v0  ;;  %444 = vmatprep.subr.bf16.mxu0 %v560_v0  ;;  %v497_v2 = vld [vmem:[#allocation3 + $0x30] sm:$0xff]   ;;  %v71_v3 = vld [vmem:[%s688_s3] sm:$0x3]  ;;  %v69_v6 = vld [vmem:[%s686_s1 + $0x8] sm:$0xff]  ;;  %vm79_vm2 = vcmask 31744   ;;  %vm391_vm7 = vcmask 7168  }
  0x1d   :  { %446 = vmatprep.mubr.msk.bf16.mxu0 %vm561_vm0, %v560_v0  ;;  %466 = vmatprep.mubr.msk.bf16.mxu1 %vm561_vm0, %v560_v0  ;;  %v85_v4 = vsel %vm83_vm1, %v71_v3, 0  ;;  %v68_v5 = vld [vmem:[%s686_s1] sm:$0xff]  ;;  %v498_v8 = vld [vmem:[#allocation3 + $0x28] sm:$0xff]   ;;  %v500_v10 = vld [vmem:[#allocation3 + $0x18] sm:$0xff]  }
  0x1e   :  { %451 = vmatpush3.bf16.msra.mxu1 %v496_v1  ;;  %445 = vmatpush3.bf16.msra.mxu0 %v85_v4  ;;  %v70_v7 = vpack.c.bf16 %v69_v6, %v68_v5  ;;  %v499_v9 = vld [vmem:[#allocation3 + $0x20] sm:$0xff]   ;;  %v501_v11 = vld [vmem:[#allocation3 + $0x10] sm:$0xff]   ;;  %v502_v12 = vld [vmem:[#allocation3 + $0x8] sm:$0xff]  }
  0x1f   :  { %452 = vmatprep.subr.bf16.mxu1 %v560_v0  ;;  %470 = vmatprep.subr.bf16.mxu0 %v560_v0  ;;  %v503_v13 = vld [vmem:[#allocation3] sm:$0xff]   ;;  %v133_v15 = vld [vmem:[%s685_s0 + $0x8] sm:$0xff]  ;;  %v504_v17 = vld [vmem:[#allocation5 + $0x38] sm:$0xff]  }
  0x20   :  { %v132_v14 = vld [vmem:[%s685_s0] sm:$0xff]  ;;  %v505_v18 = vld [vmem:[#allocation5 + $0x30] sm:$0xff]   ;;  %v506_v19 = vld [vmem:[#allocation5 + $0x28] sm:$0xff]  }
  0x21   :  { %447 = vmatmul.mubr.msk.bf16.vlgmr.msra.gmra.mxu0 %vm79_vm2, %v70_v7  ;;  %v134_v16 = vpack.c.bf16 %v133_v15, %v132_v14  ;;  %v507_v20 = vld [vmem:[#allocation5 + $0x20] sm:$0xff]   ;;  %v508_v21 = vld [vmem:[#allocation5 + $0x18] sm:$0xff]   ;;  %v509_v22 = vld [vmem:[#allocation5 + $0x10] sm:$0xff]  }
  0x22   :  { %453 = vmatpush3.bf16.msra.mxu1 %v497_v2  ;;  %486 = vmatprep.mubr.msk.bf16.mxu0 %vm561_vm0, %v560_v0  ;;  %v510_v23 = vld [vmem:[#allocation5 + $0x8] sm:$0xff]   ;;  %v511_v24 = vld [vmem:[#allocation5] sm:$0xff]  }
  0x23   :  { %454 = vmatprep.subr.bf16.mxu1 %v560_v0  ;;  %471 = vmatpush3.bf16.msra.mxu0 %v504_v17  ;;  %v404_v29 = vld [vmem:[%s689_s4] ss:$0 sm:$0xff] }
  0x24   :  { %472 = vmatprep.subr.bf16.mxu0 %v560_v0  ;;  %v414_v43 = vld [vmem:[%s691_s6] ss:$0 sm:$0xff] }
  0x25   :  { %v423_v48 = vld [vmem:[%s692_s7] ss:$0 sm:$0xff] }
  0x26   :  { %455 = vmatpush3.bf16.msra.mxu1 %v498_v8 }
  0x27   :  { %456 = vmatprep.subr.bf16.mxu1 %v560_v0  ;;  %473 = vmatpush3.bf16.msra.mxu0 %v505_v18 }
  0x28   :  { %474 = vmatprep.subr.bf16.mxu0 %v560_v0 }
  0x2a   :  { %457 = vmatpush3.bf16.msra.mxu1 %v499_v9 }
  0x2b   :  { %458 = vmatprep.subr.bf16.mxu1 %v560_v0  ;;  %475 = vmatpush3.bf16.msra.mxu0 %v506_v19 }
  0x2c   :  { %476 = vmatprep.subr.bf16.mxu0 %v560_v0 }
  0x2e   :  { %459 = vmatpush3.bf16.msra.mxu1 %v500_v10 }
  0x2f   :  { %460 = vmatprep.subr.bf16.mxu1 %v560_v0  ;;  %477 = vmatpush3.bf16.msra.mxu0 %v507_v20 }
  0x30   :  { %478 = vmatprep.subr.bf16.mxu0 %v560_v0 }
  0x32   :  { %461 = vmatpush3.bf16.msra.mxu1 %v501_v11 }
  0x33   :  { %462 = vmatprep.subr.bf16.mxu1 %v560_v0  ;;  %479 = vmatpush3.bf16.msra.mxu0 %v508_v21 }
  0x34   :  { %480 = vmatprep.subr.bf16.mxu0 %v560_v0 }
  0x36   :  { %463 = vmatpush3.bf16.msra.mxu1 %v502_v12 }
  0x37   :  { %464 = vmatprep.subr.bf16.mxu1 %v560_v0  ;;  %481 = vmatpush3.bf16.msra.mxu0 %v509_v22 }
  0x38   :  { %482 = vmatprep.subr.bf16.mxu0 %v560_v0 }
  0x3a   :  { %465 = vmatpush3.bf16.msra.mxu1 %v503_v13 }
  0x3b   :  { %483 = vmatpush3.bf16.msra.mxu0 %v510_v23 }
  0x3c   :  { %484 = vmatprep.subr.bf16.mxu0 %v560_v0 }
  0x3d   :  { %467 = vmatmul.mubr.bf16.vlgmr.msra.gmra.mxu1 %v134_v16 }
  0x3f   :  { %485 = vmatpush3.bf16.msra.mxu0 %v511_v24 }
  0xe1   :  { %v121_v25 = vpop.f32.mrf.mxu0 }
  0xe2   :  { %v122_v30 = vadd.f32 %v404_v29, %v121_v25 }
  0xe3   :  { %v448_v26 = vpop.f32.mrf.mxu0 }
  0xe5   :  { %v124_v27 = vpop.f32.mrf.mxu0 }
  0xe6   :  { %v125_v34 = vadd.f32 %v404_v29, %v124_v27 }
  0xe7   :  { %v449_v28 = vpop.f32.mrf.mxu0 }
  0xfd   :  { %v233_v31 = vpop.f32.mrf.mxu1 }
  0xfe   :  { %v240_v32 = vadd.f32 %v233_v31, %v122_v30 }
  0xff   :  { %v468_v33 = vpop.f32.mrf.mxu1 }
 0x100   :  { %242 = vst [vmem:[%s694_s9] sm:$0xff] %v240_v32  ;;  %v251_v37 = vmul.f32 0.01, %v240_v32  ;;  %vm249_vm3 = vcmp.gt.f32.partialorder %v240_v32, 0.0 }
 0x101   :  { %v236_v35 = vpop.f32.mrf.mxu1 }
 0x102   :  { %v241_v36 = vadd.f32 %v236_v35, %v125_v34  ;;  %v253_v40 = vsel %vm249_vm3, %v240_v32, %v251_v37 }
 0x103   :  { %v469_v38 = vpop.f32.mrf.mxu1 }
 0x104   :  { %243 = vst [vmem:[%s694_s9 + $0x8] sm:$0xff] %v241_v36  ;;  %vm250_vm4 = vcmp.gt.f32.partialorder %v241_v36, 0.0  ;;  %v252_v39 = vmul.f32 0.01, %v241_v36 }
 0x106   :  { %v254_v41 = vsel %vm250_vm4, %v241_v36, %v252_v39 }
 0x107   :  { %v255_v42 = vpack.c.bf16 %v254_v41, %v253_v40 }
 0x109   :  { %487 = vmatmul.mubr.bf16.vlgmr.msra.gmra.mxu0 %v255_v42 }
 0x1c9   :  { %v361_v44 = vpop.f32.mrf.mxu0 }
 0x1ca   :  { %v362_v45 = vadd.f32 %v414_v43, %v361_v44 }
 0x1cb   :  { %v488_v46 = vpop.f32.mrf.mxu0 }
 0x1cc   :  { %v370_v47 = vmul.f32 0.01, %v362_v45  ;;  %vm368_vm5 = vcmp.gt.f32.partialorder %v362_v45, 0.0 }
 0x1cd   :  { %v364_v49 = vpop.f32.mrf.mxu0 }
 0x1ce   :  { %v365_v50 = vadd.f32 %v414_v43, %v364_v49  ;;  %v372_v51 = vsel %vm368_vm5, %v362_v45, %v370_v47 }
 0x1cf   :  { %v489_v52 = vpop.f32.mrf.mxu0  ;;  %v381_v53 = vmul.f32 %v423_v48, %v372_v51 }
 0x1d0   :  { %v371_v54 = vmul.f32 0.01, %v365_v50  ;;  %vm369_vm6 = vcmp.gt.f32.partialorder %v365_v50, 0.0 }
 0x1d1   :  { %383 = vadd.xlane.f32.xlu0 %v381_v53 }
 0x1d2   :  { %v373_v55 = vsel %vm369_vm6, %v365_v50, %v371_v54 }
 0x1d3   :  { %v382_v56 = vmul.f32 %v423_v48, %v373_v55 }
 0x1d5   :  { %385 = vadd.xlane.f32.xlu0 %v382_v56 }
 0x25a   :  { %v384_v58 = vpop.xlane.xlu0 %383 }
 0x25b   :  { %v389_v59 = vadd.f32 %v388_v57, %v384_v58 }
 0x25d   :  { %392 = vst.msk [vmem:[%s695_s10] sm:$0xff] %vm391_vm7, %v389_v59 }
 0x25e   :  { %v386_v60 = vpop.xlane.xlu0 %385 }
 0x25f   :  { %v390_v61 = vadd.f32 %v388_v57, %v386_v60 }
 0x261   :  { %393 = vst.msk [vmem:[%s695_s10 + $0x8] sm:$0xff] %vm391_vm7, %v390_v61 }
 0x262   :  { %402 = vsyncpa [#allocation4], 1 }
 0x263   :  { %403 = vsyncpa [#allocation6], 1 }

</bundles_post_ra>
